<compile_context>
chip_gen: v5e
topology: v5e:2x2
jax: 0.10.0
libtpu: 0.0.40
codegen_flags: <defaults>
</compile_context>

<pallas_src>
import jax
import jax.numpy as jnp
from jax.experimental import pallas as pl
from jax.experimental.pallas import tpu as pltpu


def _linear_relu_t_kernel(x_ref, w_ref, b_ref, o_ref):
    x = x_ref[...]        # (TN, 10) f32  -- batch rows on sublanes
    w = w_ref[...]        # (2, 10)  f32  -- PyTorch weight layout, resident
    b = b_ref[...]        # (2, 1)   f32  -- resident
    # (2, TN) = W @ X^T via NT contraction on the MXU; result is lane-dense.
    y = jax.lax.dot_general(
        w, x,
        dimension_numbers=(((1,), (1,)), ((), ())),
        preferred_element_type=jnp.float32,
    )
    o_ref[...] = jnp.maximum(y + b, 0.0)


def comparison_net_binary_forward(x, weight, bias, *, tile=1024):
    """Forward pass of Comparison_Net_Binary.

    x:      any shape whose total element count is divisible by 10
            (mirrors PyTorch's x.view(-1, 10)).
    weight: (2, 10)  -- PyTorch nn.Linear convention.
    bias:   (2,)
    returns (N, 2) float32 with N = x.size // 10.
    """
    if x.size % 10 != 0:
        raise ValueError(
            f"Comparison_Net_Binary: total elements ({x.size}) not divisible by 10")
    x2d = x.reshape(-1, 10).astype(jnp.float32)          # PyTorch .view(-1, 10)
    n = x2d.shape[0]
    w = weight.astype(jnp.float32).reshape(2, 10)
    b = bias.astype(jnp.float32).reshape(2, 1)

    # Tile choice: when tiling is needed the tile must be a multiple of 128
    # (lane-dense output blocks) and 8 (sublane-aligned input blocks);
    # otherwise use a single full-extent block (always legal).
    if n > tile:
        if tile % 128 != 0:
            raise ValueError("tile must be a multiple of 128 when n > tile")
        tn = tile
    else:
        tn = n
    grid = pl.cdiv(n, tn)        # ragged last block is masked by Pallas

    out_t = pl.pallas_call(
        _linear_relu_t_kernel,
        out_shape=jax.ShapeDtypeStruct((2, n), jnp.float32),
        grid_spec=pl.GridSpec(
            grid=(grid,),
            in_specs=[
                pl.BlockSpec((tn, 10), lambda i: (i, 0)),   # row block of x
                pl.BlockSpec((2, 10), lambda i: (0, 0)),    # resident weight
                pl.BlockSpec((2, 1), lambda i: (0, 0)),     # resident bias
            ],
            out_specs=pl.BlockSpec((2, tn), lambda i: (0, i)),  # lane-dense
        ),
        compiler_params=pltpu.CompilerParams(
            dimension_semantics=("parallel",)),
        cost_estimate=pl.CostEstimate(
            flops=40 * n, transcendentals=0, bytes_accessed=48 * n + 88),
    )(x2d, w, b)

    # Tiny fix-up: (2, N) -> (N, 2); touches only 8N bytes.
    return out_t.T


def _reference(x, weight, bias):
    x2d = x.reshape(-1, 10).astype(jnp.float32)
    return jnp.maximum(x2d @ weight.T + bias, 0.0)


if __name__ == "__main__":
    key = jax.random.PRNGKey(0)
    k_x, k_w, k_b, k_x2 = jax.random.split(key, 4)

    # Params mimic nn.Linear(10, 2) default init: U(-1/sqrt(10), 1/sqrt(10)).
    bound = 10.0 ** -0.5
    weight = jax.random.uniform(k_w, (2, 10), minval=-bound, maxval=bound,
                                dtype=jnp.float32)
    bias = jax.random.uniform(k_b, (2,), minval=-bound, maxval=bound,
                              dtype=jnp.float32)

    # Case 1: small batch -> single full-extent block.
    x_small = jax.random.normal(k_x, (8, 10), dtype=jnp.float32)
    out_small = jax.block_until_ready(
        comparison_net_binary_forward(x_small, weight, bias))
    ref_small = _reference(x_small, weight, bias)
    assert out_small.shape == (8, 2), out_small.shape
    assert jnp.allclose(out_small, ref_small, atol=1e-5, rtol=1e-5), \
        "mismatch vs reference (small)"

    # Case 2: multi-block grid with a ragged last block (exercises the tiled
    # pipeline + masked edge stores): N=300 rows, tile=128 -> grid of 3.
    x_big = jax.random.normal(k_x2, (300, 10), dtype=jnp.float32)
    out_big = jax.block_until_ready(
        comparison_net_binary_forward(x_big, weight, bias, tile=128))
    ref_big = _reference(x_big, weight, bias)
    assert out_big.shape == (300, 2), out_big.shape
    assert jnp.allclose(out_big, ref_big, atol=1e-5, rtol=1e-5), \
        "mismatch vs reference (tiled/ragged)"

    print("KERNEL_OK")
</pallas_src>

<mosaic_0001>
module attributes {stable_mosaic.version = 11 : i64} {
  func.func @_linear_relu_t_kernel(%arg0: i32, %arg1: memref<8x10xf32, #tpu.memory_space<vmem>>, %arg2: memref<2x10xf32, #tpu.memory_space<vmem>>, %arg3: memref<2x1xf32, #tpu.memory_space<vmem>>, %arg4: memref<2x8xf32, #tpu.memory_space<vmem>>) attributes {dimension_semantics = [#tpu.dimension_semantics<parallel>], iteration_bounds = array<i64: 1>, scalar_prefetch = 0 : i64, scratch_operands = 0 : i64, tpu.core_type = #tpu.core_type<tc>, window_params = [{transform_indices = @transform_0, window_bounds = array<i64: 8, 10>}, {pipeline_mode = #tpu.pipeline_mode<synchronous>, transform_indices = @transform_1, window_bounds = array<i64: 2, 10>}, {pipeline_mode = #tpu.pipeline_mode<synchronous>, transform_indices = @transform_2, window_bounds = array<i64: 2, 1>}, {transform_indices = @transform_3, window_bounds = array<i64: 2, 8>}]} {
    %c0 = arith.constant 0 : index
    %c0_0 = arith.constant 0 : index
    %0 = vector.load %arg1[%c0, %c0_0] : memref<8x10xf32, #tpu.memory_space<vmem>>, vector<8x10xf32>
    %c0_1 = arith.constant 0 : index
    %c0_2 = arith.constant 0 : index
    %1 = vector.load %arg2[%c0_1, %c0_2] : memref<2x10xf32, #tpu.memory_space<vmem>>, vector<2x10xf32>
    %c0_3 = arith.constant 0 : index
    %c0_4 = arith.constant 0 : index
    %2 = vector.load %arg3[%c0_3, %c0_4] : memref<2x1xf32, #tpu.memory_space<vmem>>, vector<2x1xf32>
    %cst = arith.constant dense<0.000000e+00> : vector<2x8xf32>
    %3 = tpu.matmul %1, %0, %cst {dimension_numbers = #tpu.dot_dimension_numbers<[1], [1], [0], [0], [0, 0, 1, 0], [], []>} : vector<2x10xf32>, vector<8x10xf32>, vector<2x8xf32> -> vector<2x8xf32>
    %4 = vector.broadcast %2 : vector<2x1xf32> to vector<2x8xf32>
    %5 = arith.addf %3, %4 : vector<2x8xf32>
    %cst_5 = arith.constant 0.000000e+00 : f32
    %6 = vector.broadcast %cst_5 : f32 to vector<2x8xf32>
    %7 = arith.maximumf %5, %6 : vector<2x8xf32>
    %c0_6 = arith.constant 0 : index
    %c0_7 = arith.constant 0 : index
    %8 = vector.load %arg4[%c0_6, %c0_7] : memref<2x8xf32, #tpu.memory_space<vmem>>, vector<2x8xf32>
    tpu.vector_store %arg4[%c0_6, %c0_7], %7 {strides = array<i32>} : memref<2x8xf32, #tpu.memory_space<vmem>>, vector<2x8xf32>,
    return
  }
  func.func @transform_0(%arg0: i32) -> (i32, i32) {
    %c0_i32 = arith.constant 0 : i32
    %c0_i32_0 = arith.constant 0 : i32
    return %arg0, %c0_i32 : i32, i32
  }
  func.func @transform_1(%arg0: i32) -> (i32, i32) {
    %c0_i32 = arith.constant 0 : i32
    %c0_i32_0 = arith.constant 0 : i32
    %c0_i32_1 = arith.constant 0 : i32
    return %c0_i32, %c0_i32_0 : i32, i32
  }
  func.func @transform_2(%arg0: i32) -> (i32, i32) {
    %c0_i32 = arith.constant 0 : i32
    %c0_i32_0 = arith.constant 0 : i32
    %c0_i32_1 = arith.constant 0 : i32
    return %c0_i32, %c0_i32_0 : i32, i32
  }
  func.func @transform_3(%arg0: i32) -> (i32, i32) {
    %c0_i32 = arith.constant 0 : i32
    %c0_i32_0 = arith.constant 0 : i32
    return %c0_i32, %arg0 : i32, i32
  }
}

</mosaic_0001>

<bundles_post_ra>
// kernel: tpu_custom_call.1
= control target key start
LH: loop header
LB: loop body
LE: loop exit
PB: predicated region body
PF: predicated region fallthrough
CT: control target
= control target key end

     0   :  { %8 = vsyncpa [#allocation3], 0  ;;  %s177_s0 = inlined_call_operand.hbm [shape: f32[8,10], index: 0, kind: input, shape index: {}]   ;;  %s178_s1 = inlined_call_operand.vmem [shape: f32[2,10], index: 1, kind: input, shape index: {}]   ;;  %s179_s2 = inlined_call_operand.vmem [shape: f32[2,1], index: 2, kind: input, shape index: {}]   ;;  %s180_s3 = inlined_call_operand.hbm [shape: f32[2,8], index: 3, kind: output, shape index: {}]  }
   0x1   :  { %9 = vsyncpa [#allocation4], 0  ;;  %s15_s14 = sshll.u32 %s177_s0, 4  ;;  %s142_s15 = smov [#allocation2]   ;;  %s16_s14 = int_to_ptr.hbm [resolvable:$true] %s15_s14 }
   0x2   :  { %s17_s16 = sshll.u32 %s142_s15, 4  ;;  %s18_s16 = int_to_ptr.vmem [resolvable:$true] %s17_s16 }
   0x3   :  { %20 = dma.hbm_to_vmem [thread:$0]  %s16_s14, 128, %s18_s16, [#allocation3]  }
   0x4   :  { %138 = dma.done.wait [#allocation3], 128  }
   0x5   :  { %139 = vsyncadd [#allocation3], 4294967168  ;;  %v143_v0 = vmov 0   ;;  %vm37_vm0 = vcmask 80896   ;;  %v29_v1 = vld [vmem:[#allocation2] sm:$0xff]  ;;  %s144_s0 = smov [#allocation5]  }
   0x6   :  { %89 = vset.pattern.permute.xlu0 %v143_v0  ;;  %v31_v2 = vld [vmem:[%s179_s2] sm:$0x3]  ;;  %84 = vmatpush.xpose.msk.msra.mxu0 %vm37_vm0, %v29_v1  ;;  %s72_s21 = sshll.u32 %s144_s0, 4  ;;  %s74_s24 = sshll.u32 %s180_s3, 4  ;;  %vm65_vm1 = vcmask 58368   ;;  %s73_s21 = int_to_ptr.vmem [resolvable:$true] %s72_s21  ;;  %s75_s24 = int_to_ptr.hbm [resolvable:$true] %s74_s24 }
   0x7   :  { %v30_v3 = vld [vmem:[%s178_s1] sm:$0x3]  ;;  %34 = vperm.xlu0 %89, %v31_v2  }
   0x9   :  { %85 = vmatmul.msk.f32.vlgmr.msra.gmra.mxu0 %vm37_vm0, %v30_v3 }
  0x79   :  { %v35_v4 = vpop.permute.xlu0 %34 }
  0x86   :  { %v61_v5 = vpop.f32.mrf.mxu0 }
  0x87   :  { %v62_v6 = vadd.f32 %v61_v5, %v35_v4 }
  0x89   :  { %v64_v7 = vmax.f32 %v62_v6, 0.0 }
  0x8b   :  { %66 = vst.msk [vmem:[#allocation5] sm:$0x3] %vm65_vm1, %v64_v7 }
  0x8c   :  { %77 = dma.vmem_to_hbm [thread:$0]  %s73_s21, 32, %s75_s24, [#allocation4]  }
  0x8d   :  { %140 = dma.done.wait [#allocation4], 32  }
  0x8e   :  { %141 = vsyncadd [#allocation4], 4294967264 }
  0x8f   :  { %82 = vsyncpa [#allocation3], 1 }
  0x90   :  { %83 = vsyncpa [#allocation4], 1 }

</bundles_post_ra>
